<compile_context>
chip_gen: v7x
topology: tpu7x:2x2x1
jax: 0.10.0
libtpu: 0.0.40
codegen_flags: <defaults>
</compile_context>

<pallas_src>
import jax
import jax.numpy as jnp
from jax import lax
from jax.experimental import pallas as pl
from jax.experimental.pallas import tpu as pltpu


def _critic_kernel(x_ref, noise_ref, w1_ref, b1_ref, mask_ref, w2_ref, b2_ref,
                   o_ref):
    # inputs += Normal(0, noise_std)   (elementwise on the VPU, f32)
    xin = x_ref[...].astype(jnp.float32) + noise_ref[...].astype(jnp.float32)

    # Layer 1: spectral-normalized Linear -> Tanh (MXU matmul, f32 accumulate;
    # tanh goes to the EUP).
    h = jnp.dot(xin.astype(w1_ref.dtype), w1_ref[...],
                preferred_element_type=jnp.float32)
    h = jnp.tanh(h + b1_ref[...].astype(jnp.float32))

    # Dropout(0.1): inverted-dropout keep-mask (values are 0 or 1/(1-p)),
    # kept in f32 for the elementwise path.
    h = h * mask_ref[...].astype(jnp.float32)

    # Layer 2: Linear -> Sigmoid. Keep f32 accumulate; sigmoid written out
    # explicitly (exp on the EUP) to match the reference bit-for-bit closely.
    out = jnp.dot(h.astype(w2_ref.dtype), w2_ref[...],
                  preferred_element_type=jnp.float32)
    out = out + b2_ref[...].astype(jnp.float32)
    o_ref[...] = (1.0 / (1.0 + jnp.exp(-out))).astype(o_ref.dtype)


def net_critic_forward(x, noise, w1, b1, mask, w2, b2, *, block_rows=1024,
                       matmul_dtype=None):
    """NetCritic forward inside a single batch-tiled Pallas kernel.

    x     : (B, input_size)      noise : (B, input_size)   (std-scaled Gaussian)
    w1    : (input_size, hidden) b1    : (1, hidden)        (w1 spectral-normalized)
    mask  : (B, hidden)          inverted-dropout keep mask (0 or 1/(1-p); ones for eval)
    w2    : (hidden, output)     b2    : (1, output)
    returns (B, output) float32 (sigmoid outputs)
    """
    B, in_dim = x.shape
    hid = w1.shape[1]
    out_dim = w2.shape[1]

    if matmul_dtype is not None:
        # bf16 on v6e/v7x: halves HBM traffic on the dominant x/noise streams
        # and feeds the MXU natively; accuracy preserved by f32 accumulate.
        # (On v7x prefer fp8 -- not int8 -- if weights are later quantized.)
        x = x.astype(matmul_dtype)
        noise = noise.astype(matmul_dtype)
        w1 = w1.astype(matmul_dtype)
        w2 = w2.astype(matmul_dtype)

    # Batch tile: full batch if small, otherwise a large (>=512-row) tile so
    # the pipelined DMA reaches ~85% of the HBM roofline.
    tb = B if B <= block_rows else block_rows
    grid = (pl.cdiv(B, tb),)

    # Row-streamed arrays advance with the grid; weights/biases use a constant
    # index map so they are DMA'd once and stay VMEM-resident.
    def row_spec(cols):
        return pl.BlockSpec((tb, cols), lambda i: (i, 0))

    def resident(shape):
        return pl.BlockSpec(shape, lambda i: (0,) * len(shape))

    # VMEM budget: 2x double-buffered row tiles + resident params + headroom.
    itemsize = 4
    tile_bytes = (2 * tb * in_dim + tb * hid + tb * out_dim) * itemsize
    param_bytes = (in_dim * hid + hid + hid * out_dim + out_dim) * itemsize
    vmem_bytes = min(max(2 * tile_bytes + 2 * param_bytes + (4 << 20), 16 << 20),
                     32 << 20)

    return pl.pallas_call(
        _critic_kernel,
        out_shape=jax.ShapeDtypeStruct((B, out_dim), jnp.float32),
        grid=grid,
        in_specs=[
            row_spec(in_dim),      # x
            row_spec(in_dim),      # noise
            resident(w1.shape),    # w1 (VMEM-resident across the batch grid)
            resident(b1.shape),    # b1
            row_spec(hid),         # dropout keep mask
            resident(w2.shape),    # w2
            resident(b2.shape),    # b2
        ],
        out_specs=row_spec(out_dim),
        compiler_params=pltpu.CompilerParams(
            dimension_semantics=("parallel",),   # shard batch across TCs (v7x)
            vmem_limit_bytes=vmem_bytes,
        ),
    )(x, noise, w1, b1, mask, w2, b2)


def spectral_norm_weight(w, n_iters=50, eps=1e-12):
    """W / sigma_max(W) via power iteration (what torch spectral_norm applies)."""
    v = jnp.ones((w.shape[1],), w.dtype) / jnp.sqrt(float(w.shape[1]))

    def body(_, v):
        u = w @ v
        u = u / (jnp.linalg.norm(u) + eps)
        v = w.T @ u
        return v / (jnp.linalg.norm(v) + eps)

    v = lax.fori_loop(0, n_iters, body, v)
    sigma = jnp.linalg.norm(w @ v)
    return w / (sigma + eps)


def init_params(key, input_size, hidden_size, output_size, dtype=jnp.float32):
    """torch.nn.Linear-style uniform fan-in init; layer 1 spectral-normalized."""
    k1, k2, k3, k4 = jax.random.split(key, 4)
    lim1 = 1.0 / (input_size ** 0.5)
    lim2 = 1.0 / (hidden_size ** 0.5)
    w1 = jax.random.uniform(k1, (input_size, hidden_size), dtype, -lim1, lim1)
    b1 = jax.random.uniform(k2, (1, hidden_size), dtype, -lim1, lim1)
    w2 = jax.random.uniform(k3, (hidden_size, output_size), dtype, -lim2, lim2)
    b2 = jax.random.uniform(k4, (1, output_size), dtype, -lim2, lim2)
    w1 = spectral_norm_weight(w1)   # torch.nn.utils.spectral_norm on layer 1
    return w1, b1, w2, b2


def reference_forward(x, noise, w1, b1, mask, w2, b2):
    xin = x + noise
    h = jnp.tanh(xin @ w1 + b1)
    h = h * mask
    z = h @ w2 + b2
    return 1.0 / (1.0 + jnp.exp(-z))


if __name__ == "__main__":
    # Small shapes consistent with the module: layer_num=2, hidden_size=[32],
    # input_size=16, output_size=1 (critic value head), batch=512.
    batch, input_size, hidden, output_size = 512, 16, 32, 1
    noise_std, dropout_p = 0.1, 0.1

    key = jax.random.PRNGKey(0)
    kx, kn, kd, kp = jax.random.split(key, 4)

    x = jax.random.normal(kx, (batch, input_size), jnp.float32)
    noise = noise_std * jax.random.normal(kn, (batch, input_size), jnp.float32)
    keep = jax.random.bernoulli(kd, 1.0 - dropout_p, (batch, hidden))
    mask = keep.astype(jnp.float32) / (1.0 - dropout_p)   # inverted dropout
    w1, b1, w2, b2 = init_params(kp, input_size, hidden, output_size)

    # block_rows=128 exercises the multi-step, double-buffered batch grid even
    # at this small demo batch (production default is 1024+ rows per tile).
    out = net_critic_forward(x, noise, w1, b1, mask, w2, b2, block_rows=128)
    out = jax.block_until_ready(out)

    ref = reference_forward(x, noise, w1, b1, mask, w2, b2)
    assert out.shape == (batch, output_size)
    assert bool(jnp.all(jnp.isfinite(out)))
    assert jnp.allclose(out, ref, atol=1e-5, rtol=1e-5), "mismatch vs reference"

    print("KERNEL_OK")
</pallas_src>

<mosaic_0001>
module attributes {stable_mosaic.version = 11 : i64} {
  func.func @_critic_kernel(%arg0: i32, %arg1: memref<128x16xf32, #tpu.memory_space<vmem>>, %arg2: memref<128x16xf32, #tpu.memory_space<vmem>>, %arg3: memref<16x32xf32, #tpu.memory_space<vmem>>, %arg4: memref<1x32xf32, #tpu.memory_space<vmem>>, %arg5: memref<128x32xf32, #tpu.memory_space<vmem>>, %arg6: memref<32x1xf32, #tpu.memory_space<vmem>>, %arg7: memref<1x1xf32, #tpu.memory_space<vmem>>, %arg8: memref<128x1xf32, #tpu.memory_space<vmem>>) attributes {dimension_semantics = [#tpu.dimension_semantics<parallel>], iteration_bounds = array<i64: 4>, scalar_prefetch = 0 : i64, scratch_operands = 0 : i64, tpu.core_type = #tpu.core_type<tc>, window_params = [{transform_indices = @transform_0, window_bounds = array<i64: 128, 16>}, {transform_indices = @transform_1, window_bounds = array<i64: 128, 16>}, {pipeline_mode = #tpu.pipeline_mode<synchronous>, transform_indices = @transform_2, window_bounds = array<i64: 16, 32>}, {pipeline_mode = #tpu.pipeline_mode<synchronous>, transform_indices = @transform_3, window_bounds = array<i64: 1, 32>}, {transform_indices = @transform_4, window_bounds = array<i64: 128, 32>}, {pipeline_mode = #tpu.pipeline_mode<synchronous>, transform_indices = @transform_5, window_bounds = array<i64: 32, 1>}, {pipeline_mode = #tpu.pipeline_mode<synchronous>, transform_indices = @transform_6, window_bounds = array<i64: 1, 1>}, {transform_indices = @transform_7, window_bounds = array<i64: 128, 1>}]} {
    %c0 = arith.constant 0 : index
    %c0_0 = arith.constant 0 : index
    %0 = vector.load %arg1[%c0, %c0_0] : memref<128x16xf32, #tpu.memory_space<vmem>>, vector<128x16xf32>
    %c0_1 = arith.constant 0 : index
    %c0_2 = arith.constant 0 : index
    %1 = vector.load %arg2[%c0_1, %c0_2] : memref<128x16xf32, #tpu.memory_space<vmem>>, vector<128x16xf32>
    %2 = arith.addf %0, %1 : vector<128x16xf32>
    %c0_3 = arith.constant 0 : index
    %c0_4 = arith.constant 0 : index
    %3 = vector.load %arg3[%c0_3, %c0_4] : memref<16x32xf32, #tpu.memory_space<vmem>>, vector<16x32xf32>
    %cst = arith.constant dense<0.000000e+00> : vector<128x32xf32>
    %4 = tpu.matmul %2, %3, %cst {dimension_numbers = #tpu.dot_dimension_numbers<[1], [0], [0], [1], [0, 0, 1, 1], [], []>} : vector<128x16xf32>, vector<16x32xf32>, vector<128x32xf32> -> vector<128x32xf32>
    %c0_5 = arith.constant 0 : index
    %c0_6 = arith.constant 0 : index
    %5 = vector.load %arg4[%c0_5, %c0_6] : memref<1x32xf32, #tpu.memory_space<vmem>>, vector<1x32xf32>
    %6 = vector.broadcast %5 : vector<1x32xf32> to vector<128x32xf32>
    %7 = arith.addf %4, %6 : vector<128x32xf32>
    %8 = math.tanh %7 : vector<128x32xf32>
    %c0_7 = arith.constant 0 : index
    %c0_8 = arith.constant 0 : index
    %9 = vector.load %arg5[%c0_7, %c0_8] : memref<128x32xf32, #tpu.memory_space<vmem>>, vector<128x32xf32>
    %10 = arith.mulf %8, %9 : vector<128x32xf32>
    %c0_9 = arith.constant 0 : index
    %c0_10 = arith.constant 0 : index
    %11 = vector.load %arg6[%c0_9, %c0_10] : memref<32x1xf32, #tpu.memory_space<vmem>>, vector<32x1xf32>
    %cst_11 = arith.constant dense<0.000000e+00> : vector<128x1xf32>
    %12 = tpu.matmul %10, %11, %cst_11 {dimension_numbers = #tpu.dot_dimension_numbers<[1], [0], [0], [1], [0, 0, 1, 1], [], []>} : vector<128x32xf32>, vector<32x1xf32>, vector<128x1xf32> -> vector<128x1xf32>
    %c0_12 = arith.constant 0 : index
    %c0_13 = arith.constant 0 : index
    %13 = vector.load %arg7[%c0_12, %c0_13] : memref<1x1xf32, #tpu.memory_space<vmem>>, vector<1x1xf32>
    %14 = vector.broadcast %13 : vector<1x1xf32> to vector<128x1xf32>
    %15 = arith.addf %12, %14 : vector<128x1xf32>
    %cst_14 = arith.constant 0.000000e+00 : f32
    %16 = vector.broadcast %cst_14 : f32 to vector<128x1xf32>
    %17 = arith.subf %16, %15 : vector<128x1xf32>
    %18 = math.exp %17 : vector<128x1xf32>
    %cst_15 = arith.constant 1.000000e+00 : f32
    %19 = vector.broadcast %cst_15 : f32 to vector<128x1xf32>
    %20 = arith.addf %19, %18 : vector<128x1xf32>
    %cst_16 = arith.constant 1.000000e+00 : f32
    %21 = vector.broadcast %cst_16 : f32 to vector<128x1xf32>
    %22 = arith.divf %21, %20 : vector<128x1xf32>
    %c0_17 = arith.constant 0 : index
    %c0_18 = arith.constant 0 : index
    %23 = vector.load %arg8[%c0_17, %c0_18] : memref<128x1xf32, #tpu.memory_space<vmem>>, vector<128x1xf32>
    tpu.vector_store %arg8[%c0_17, %c0_18], %22 {strides = array<i32>} : memref<128x1xf32, #tpu.memory_space<vmem>>, vector<128x1xf32>,
    return
  }
  func.func @transform_0(%arg0: i32) -> (i32, i32) {
    %c0_i32 = arith.constant 0 : i32
    %c0_i32_0 = arith.constant 0 : i32
    return %arg0, %c0_i32 : i32, i32
  }
  func.func @transform_1(%arg0: i32) -> (i32, i32) {
    %c0_i32 = arith.constant 0 : i32
    %c0_i32_0 = arith.constant 0 : i32
    return %arg0, %c0_i32 : i32, i32
  }
  func.func @transform_2(%arg0: i32) -> (i32, i32) {
    %c0_i32 = arith.constant 0 : i32
    %c0_i32_0 = arith.constant 0 : i32
    %c0_i32_1 = arith.constant 0 : i32
    return %c0_i32, %c0_i32_0 : i32, i32
  }
  func.func @transform_3(%arg0: i32) -> (i32, i32) {
    %c0_i32 = arith.constant 0 : i32
    %c0_i32_0 = arith.constant 0 : i32
    %c0_i32_1 = arith.constant 0 : i32
    return %c0_i32, %c0_i32_0 : i32, i32
  }
  func.func @transform_4(%arg0: i32) -> (i32, i32) {
    %c0_i32 = arith.constant 0 : i32
    %c0_i32_0 = arith.constant 0 : i32
    return %arg0, %c0_i32 : i32, i32
  }
  func.func @transform_5(%arg0: i32) -> (i32, i32) {
    %c0_i32 = arith.constant 0 : i32
    %c0_i32_0 = arith.constant 0 : i32
    %c0_i32_1 = arith.constant 0 : i32
    return %c0_i32, %c0_i32_0 : i32, i32
  }
  func.func @transform_6(%arg0: i32) -> (i32, i32) {
    %c0_i32 = arith.constant 0 : i32
    %c0_i32_0 = arith.constant 0 : i32
    %c0_i32_1 = arith.constant 0 : i32
    return %c0_i32, %c0_i32_0 : i32, i32
  }
  func.func @transform_7(%arg0: i32) -> (i32, i32) {
    %c0_i32 = arith.constant 0 : i32
    %c0_i32_0 = arith.constant 0 : i32
    return %arg0, %c0_i32 : i32, i32
  }
}

</mosaic_0001>

<bundles_post_ra>
// kernel: tpu_custom_call.1
= control target key start
LH: loop header
LB: loop body
LE: loop exit
PB: predicated region body
PF: predicated region fallthrough
CT: control target
= control target key end

     0   :  { %s1339_s26 = smov 0   ;;  %s1545_s0 = inlined_call_operand.vmem [shape: f32[512,16], index: 0, kind: input, shape index: {}]   ;;  %s1546_s1 = inlined_call_operand.vmem [shape: f32[512,16], index: 1, kind: input, shape index: {}]   ;;  %s1547_s2 = inlined_call_operand.vmem [shape: f32[16,32], index: 2, kind: input, shape index: {}]   ;;  %s1548_s3 = inlined_call_operand.vmem [shape: f32[1,32], index: 3, kind: input, shape index: {}]   ;;  %s1549_s4 = inlined_call_operand.vmem [shape: f32[512,32], index: 4, kind: input, shape index: {}]   ;;  %s1550_s5 = inlined_call_operand.vmem [shape: f32[32,1], index: 5, kind: input, shape index: {}]   ;;  %s1551_s6 = inlined_call_operand.<no memory space> [shape: f32[1,1], index: 6, kind: input, shape index: {}]   ;;  %s1552_s7 = inlined_call_operand.vmem [shape: f32[512,1], index: 7, kind: output, shape index: {}]  }
   0x1   :  { %v12_v0 = vstv %s1551_s6 }
   0x2   :  { %13 = vst [vmem:[#allocation2] sm:$0x1] %v12_v0 }
   0x3 LB: > { %s1025_s27 = sadd.s32 4294967295, %s1294_s26   ;;  %p1029_p0 = scmp.ge.s32.totalorder %s1294_s26, 1  ;;  %s1294_s26 = sphi %s1339_s26, %s19_s26  }
   0x4   : > { %p262_p1 = scmp.lt.s32.totalorder %s1294_s26, 5 }
   0x6   : > { %p263_p2 = pnand %p1029_p0, %p262_p1 }
   0x7   : > { %v376_v1 = vld [vmem:[%s1547_s2] sm:$0xff] (!%p263_p2)  ;;  %v377_v2 = vld [vmem:[%s1547_s2 + $0x8] sm:$0xff] (!%p263_p2)  ;;  %s1030_s8 = sshll.u32 (!%p263_p2), %s1025_s27, 4  ;;  %vm385_vm0 = vcmask (!%p263_p2), 130048   ;;  %v629_v55 = vld [vmem:[%s1550_s5 + $0x10] sm:$0xff] (!%p263_p2)  ;;  %vm638_vm1 = vcmask (!%p263_p2), 261120  }
   0x8   : > { %266 = sbr.rel (%p263_p2) target bundleno = 526 (0x20e), region = 48  ;;  %v1172_v3 = vpack.c.bf16 (!%p263_p2), %v377_v2, %v376_v1  ;;  %p305_p3 = scmp.lt.s32.totalorder (!%p263_p2), %s1030_s8, 63  ;;  %v627_v52 = vld [vmem:[%s1550_s5] sm:$0xff] (!%p263_p2)  ;;  %v628_v53 = vld [vmem:[%s1550_s5 + $0x8] sm:$0xff] (!%p263_p2)  ;;  %v630_v56 = vld [vmem:[%s1550_s5 + $0x18] sm:$0xff] (!%p263_p2)  ;;  %vm928_vm2 = vcmask (!%p263_p2), 7168  }
   0x9   : > { %v1176_v54 = vpack.c.bf16 (!%p263_p2), %v628_v53, %v627_v52  ;;  %v1180_v57 = vpack.c.bf16 (!%p263_p2), %v630_v56, %v629_v55  ;;  %v1430_v58 = vld [vmem:[%s1548_s3] ss:$0 sm:$0xff] (!%p263_p2) }
   0xa   : > { %1173 = vmatprep.subr.bf16.mxu0 (!%p263_p2), %v1172_v3 }
   0xb   : > { %1175 = vmatpush3.bf16.msra.mxu0 (!%p263_p2), %v1172_v3  ;;  %1177 = vmatprep.subr.bf16.mxu1 (!%p263_p2), %v1176_v54 }
   0xc   : > { %1179 = vmatpush3.bf16.msra.mxu1 (!%p263_p2), %v1176_v54 }
   0xd   : > { %1181 = vmatprep.subr.bf16.mxu1 (!%p263_p2), %v1180_v57 }
   0xf   : > { %s1554_s8 = smov (!%p305_p3, %s1030_s8), 63 }
  0x10   : > { %s1353_s9 = sshll.u32 %s1554_s8, 3  ;;  %1183 = vmatpush3.bf16.msra.mxu1 %v1180_v57 }
  0x11   : > { %s1359_s12 = scalar_lea.vmem %s1545_s0, %s1353_s9  ;;  %s1365_s15 = scalar_lea.vmem %s1546_s1, %s1353_s9 }
  0x12   : > { %v328_v4 = vld [vmem:[%s1359_s12] sm:$0xff]  ;;  %v329_v6 = vld [vmem:[%s1359_s12 + $0x8] sm:$0xff]  ;;  %v330_v9 = vld [vmem:[%s1359_s12 + $0x10] sm:$0xff]  ;;  %s1441_s29 = scalar_lea.vmem %s1549_s4, %s1353_s9  ;;  %s1506_s8 = scalar_lea.vmem %s1552_s7, %s1353_s9 }
  0x13   : > { %v344_v5 = vld [vmem:[%s1365_s15] sm:$0xff]  ;;  %v345_v8 = vld [vmem:[%s1365_s15 + $0x8] sm:$0xff]  ;;  %v346_v10 = vld [vmem:[%s1365_s15 + $0x10] sm:$0xff] }
  0x14   : > { %v360_v7 = vadd.f32 %v344_v5, %v328_v4  ;;  %v361_v11 = vadd.f32 %v345_v8, %v329_v6  ;;  %v362_v12 = vadd.f32 %v346_v10, %v330_v9  ;;  %v331_v13 = vld [vmem:[%s1359_s12 + $0x18] sm:$0xff]  ;;  %v332_v15 = vld [vmem:[%s1359_s12 + $0x20] sm:$0xff]  ;;  %v333_v19 = vld [vmem:[%s1359_s12 + $0x28] sm:$0xff] }
  0x15   : > { %v347_v14 = vld [vmem:[%s1365_s15 + $0x18] sm:$0xff]  ;;  %v348_v16 = vld [vmem:[%s1365_s15 + $0x20] sm:$0xff]  ;;  %v349_v20 = vld [vmem:[%s1365_s15 + $0x28] sm:$0xff] }
  0x16   : > { %1116 = vmatprep.mubr.msk.f32.mxu0 %vm385_vm0, %v360_v7  ;;  %v363_v17 = vadd.f32 %v347_v14, %v331_v13  ;;  %v364_v18 = vadd.f32 %v348_v16, %v332_v15  ;;  %v334_v21 = vld [vmem:[%s1359_s12 + $0x30] sm:$0xff]  ;;  %v365_v23 = vadd.f32 %v349_v20, %v333_v19  ;;  %v335_v25 = vld [vmem:[%s1359_s12 + $0x38] sm:$0xff]  ;;  %v336_v27 = vld [vmem:[%s1359_s12 + $0x40] sm:$0xff] }
  0x17   : > { %1117 = vmatmul.mubr.msk.f32.vlgmr.msra.gmra.mrb[0].mxu0 %vm385_vm0, %v361_v11  ;;  %v350_v22 = vld [vmem:[%s1365_s15 + $0x30] sm:$0xff]  ;;  %v351_v26 = vld [vmem:[%s1365_s15 + $0x38] sm:$0xff]  ;;  %v352_v28 = vld [vmem:[%s1365_s15 + $0x40] sm:$0xff] }
  0x18   : > { %1119 = vmatprep.mubr.msk.f32.mxu0 %vm385_vm0, %v362_v12  ;;  %v366_v24 = vadd.f32 %v350_v22, %v334_v21  ;;  %v367_v29 = vadd.f32 %v351_v26, %v335_v25  ;;  %v368_v30 = vadd.f32 %v352_v28, %v336_v27  ;;  %v337_v31 = vld [vmem:[%s1359_s12 + $0x48] sm:$0xff]  ;;  %v338_v33 = vld [vmem:[%s1359_s12 + $0x50] sm:$0xff]  ;;  %v339_v37 = vld [vmem:[%s1359_s12 + $0x58] sm:$0xff] }
  0x19   : > { %v353_v32 = vld [vmem:[%s1365_s15 + $0x48] sm:$0xff]  ;;  %v354_v34 = vld [vmem:[%s1365_s15 + $0x50] sm:$0xff]  ;;  %v355_v38 = vld [vmem:[%s1365_s15 + $0x58] sm:$0xff] }
  0x1a   : > { %v369_v35 = vadd.f32 %v353_v32, %v337_v31  ;;  %v370_v36 = vadd.f32 %v354_v34, %v338_v33  ;;  %v340_v39 = vld [vmem:[%s1359_s12 + $0x60] sm:$0xff]  ;;  %v371_v41 = vadd.f32 %v355_v38, %v339_v37  ;;  %v341_v43 = vld [vmem:[%s1359_s12 + $0x68] sm:$0xff]  ;;  %v342_v45 = vld [vmem:[%s1359_s12 + $0x70] sm:$0xff] }
  0x1b   : > { %1120 = vmatmul.mubr.msk.f32.gmra.mrb[2].mxu0 %vm385_vm0, %v363_v17  ;;  %v356_v40 = vld [vmem:[%s1365_s15 + $0x60] sm:$0xff]  ;;  %v357_v44 = vld [vmem:[%s1365_s15 + $0x68] sm:$0xff]  ;;  %v358_v46 = vld [vmem:[%s1365_s15 + $0x70] sm:$0xff] }
  0x1c   : > { %1122 = vmatprep.mubr.msk.f32.mxu0 %vm385_vm0, %v364_v18  ;;  %v372_v42 = vadd.f32 %v356_v40, %v340_v39  ;;  %v373_v47 = vadd.f32 %v357_v44, %v341_v43  ;;  %v374_v48 = vadd.f32 %v358_v46, %v342_v45  ;;  %v343_v49 = vld [vmem:[%s1359_s12 + $0x78] sm:$0xff]  ;;  %v595_v8 = vld [vmem:[%s1441_s29] sm:$0xff]  ;;  %v596_v12 = vld [vmem:[%s1441_s29 + $0x8] sm:$0xff] }
  0x1d   : > { %v359_v50 = vld [vmem:[%s1365_s15 + $0x78] sm:$0xff]  ;;  %v597_v18 = vld [vmem:[%s1441_s29 + $0x10] sm:$0xff]  ;;  %v599_v28 = vld [vmem:[%s1441_s29 + $0x20] sm:$0xff] }
  0x1e   : > { %v375_v51 = vadd.f32 %v359_v50, %v343_v49  ;;  %v598_v22 = vld [vmem:[%s1441_s29 + $0x18] sm:$0xff]  ;;  %v600_v32 = vld [vmem:[%s1441_s29 + $0x28] sm:$0xff]  ;;  %v601_v38 = vld [vmem:[%s1441_s29 + $0x30] sm:$0xff] }
  0x1f   : > { %1123 = vmatmul.mubr.msk.f32.gmra.mrb[4].mxu0 %vm385_vm0, %v365_v23  ;;  %v604_v52 = vld [vmem:[%s1441_s29 + $0x48] sm:$0xff]  ;;  %v605_v57 = vld [vmem:[%s1441_s29 + $0x50] sm:$0xff] }
  0x20   : > { %1125 = vmatprep.mubr.msk.f32.mxu0 %vm385_vm0, %v366_v24 }
  0x23   : > { %1126 = vmatmul.mubr.msk.f32.gmra.mrb[6].mxu0 %vm385_vm0, %v367_v29 }
  0x24   : > { %1128 = vmatprep.mubr.msk.f32.mxu0 %vm385_vm0, %v368_v30 }
  0x27   : > { %1129 = vmatmul.mubr.msk.f32.gmra.mrb[8].mxu0 %vm385_vm0, %v369_v35 }
  0x28   : > { %1131 = vmatprep.mubr.msk.f32.mxu0 %vm385_vm0, %v370_v36 }
  0x2b   : > { %1132 = vmatmul.mubr.msk.f32.gmra.mrb[10].mxu0 %vm385_vm0, %v371_v41 }
  0x2c   : > { %1134 = vmatprep.mubr.msk.f32.mxu0 %vm385_vm0, %v372_v42  ;;  %v602_v42 = vld [vmem:[%s1441_s29 + $0x38] sm:$0xff] }
  0x2f   : > { %1135 = vmatmul.mubr.msk.f32.gmra.mrb[12].mxu0 %vm385_vm0, %v373_v47 }
  0x30   : > { %1137 = vmatprep.mubr.msk.f32.mxu0 %vm385_vm0, %v374_v48  ;;  %v603_v48 = vld [vmem:[%s1441_s29 + $0x40] sm:$0xff] }
  0x33   : > { %1138 = vmatmul.mubr.msk.f32.gmra.mrb[14].mxu0 %vm385_vm0, %v375_v51 }
  0xea   : > { %v1118_v59 = vpop.f32.mrb[0].mxu0 }
  0xeb   : > { %v506_v60 = vadd.f32 %v1118_v59, %v1430_v58  ;;  %v500_v61 = vpop.f32.mrb[1].mxu0 }
  0xec   : > { %v501_v62 = vadd.f32 %v1430_v58, %v500_v61 }
  0xed   : > { %1192 = vtanh.f32 %v506_v60  ;;  %v606_v60 = vld [vmem:[%s1441_s29 + $0x58] sm:$0xff] }
  0xee   : > { %1194 = vtanh.f32 %v501_v62  ;;  %v1121_v63 = vpop.f32.mrb[2].mxu0 }
  0xef   : > { %v516_v0 = vadd.f32 %v1121_v63, %v1430_v58  ;;  %v510_v1 = vpop.f32.mrb[3].mxu0 }
  0xf0   : > { %v511_v2 = vadd.f32 %v1430_v58, %v510_v1  ;;  %v608_v1 = vld [vmem:[%s1441_s29 + $0x68] sm:$0xff] }
  0xf1   : > { %1196 = vtanh.f32 %v516_v0 }
  0xf2   : > { %1198 = vtanh.f32 %v511_v2  ;;  %v1124_v3 = vpop.f32.mrb[4].mxu0 }
  0xf3   : > { %v526_v4 = vadd.f32 %v1124_v3, %v1430_v58  ;;  %v520_v5 = vpop.f32.mrb[5].mxu0 }
  0xf4   : > { %v521_v6 = vadd.f32 %v1430_v58, %v520_v5  ;;  %v609_v5 = vld [vmem:[%s1441_s29 + $0x70] sm:$0xff] }
  0xf5   : > { %1200 = vtanh.f32 %v526_v4 }
  0xf6   : > { %1202 = vtanh.f32 %v521_v6  ;;  %v1127_v7 = vpop.f32.mrb[6].mxu0 }
  0xf7   : > { %v1193_v9 = vpop.eup %1192  ;;  %v536_v10 = vadd.f32 %v1127_v7, %v1430_v58  ;;  %v530_v11 = vpop.f32.mrb[7].mxu0  ;;  %v610_v7 = vld [vmem:[%s1441_s29 + $0x78] sm:$0xff] }
  0xf8   : > { %v1195_v13 = vpop.eup %1194  ;;  %v531_v14 = vadd.f32 %v1430_v58, %v530_v11  ;;  %v612_v17 = vmul.f32 %v1193_v9, %v596_v12  ;;  %v1486_v11 = vld [vmem:[#allocation2] ss:$0 sm:$0xff] }
  0xf9   : > { %1204 = vtanh.f32 %v536_v10  ;;  %v611_v15 = vmul.f32 %v1195_v13, %v595_v8 }
  0xfa   : > { %1206 = vtanh.f32 %v531_v14  ;;  %v1130_v16 = vpop.f32.mrb[8].mxu0 }
  0xfb   : > { %v1197_v19 = vpop.eup %1196  ;;  %v546_v20 = vadd.f32 %v1130_v16, %v1430_v58  ;;  %v540_v21 = vpop.f32.mrb[9].mxu0  ;;  %1148 = vmatprep.mubr.msk.f32.mxu1 %vm638_vm1, %v611_v15 }
  0xfc   : > { %v1199_v23 = vpop.eup %1198  ;;  %v541_v24 = vadd.f32 %v1430_v58, %v540_v21  ;;  %1149 = vmatmul.mubr.msk.f32.vlgmr.msra.gmra.mrb[0].mxu1 %vm638_vm1, %v612_v17  ;;  %v614_v27 = vmul.f32 %v1197_v19, %v598_v22 }
  0xfd   : > { %1208 = vtanh.f32 %v546_v20  ;;  %v613_v25 = vmul.f32 %v1199_v23, %v597_v18 }
  0xfe   : > { %1210 = vtanh.f32 %v541_v24  ;;  %v1133_v26 = vpop.f32.mrb[10].mxu0 }
  0xff   : > { %v1201_v29 = vpop.eup %1200  ;;  %v556_v30 = vadd.f32 %v1133_v26, %v1430_v58  ;;  %v550_v31 = vpop.f32.mrb[11].mxu0  ;;  %1151 = vmatprep.mubr.msk.f32.mxu1 %vm638_vm1, %v613_v25 }
 0x100   : > { %v1203_v33 = vpop.eup %1202  ;;  %v551_v34 = vadd.f32 %v1430_v58, %v550_v31  ;;  %1152 = vmatmul.mubr.msk.f32.gmra.mrb[2].mxu1 %vm638_vm1, %v614_v27  ;;  %v616_v37 = vmul.f32 %v1201_v29, %v600_v32 }
 0x101   : > { %1212 = vtanh.f32 %v556_v30  ;;  %v615_v35 = vmul.f32 %v1203_v33, %v599_v28 }
 0x102   : > { %1214 = vtanh.f32 %v551_v34  ;;  %v1136_v36 = vpop.f32.mrb[12].mxu0 }
 0x103   : > { %v1205_v39 = vpop.eup %1204  ;;  %v566_v40 = vadd.f32 %v1136_v36, %v1430_v58  ;;  %v560_v41 = vpop.f32.mrb[13].mxu0  ;;  %1154 = vmatprep.mubr.msk.f32.mxu1 %vm638_vm1, %v615_v35 }
 0x104   : > { %v1207_v43 = vpop.eup %1206  ;;  %v561_v44 = vadd.f32 %v1430_v58, %v560_v41  ;;  %1155 = vmatmul.mubr.msk.f32.gmra.mrb[4].mxu1 %vm638_vm1, %v616_v37  ;;  %v618_v47 = vmul.f32 %v1205_v39, %v602_v42 }
 0x105   : > { %1216 = vtanh.f32 %v566_v40  ;;  %v617_v45 = vmul.f32 %v1207_v43, %v601_v38 }
 0x106   : > { %1218 = vtanh.f32 %v561_v44  ;;  %v1139_v46 = vpop.f32.mrb[14].mxu0 }
 0x107   : > { %v1209_v49 = vpop.eup %1208  ;;  %v576_v50 = vadd.f32 %v1139_v46, %v1430_v58  ;;  %v570_v51 = vpop.f32.mrb[15].mxu0  ;;  %1157 = vmatprep.mubr.msk.f32.mxu1 %vm638_vm1, %v617_v45 }
 0x108   : > { %v1211_v53 = vpop.eup %1210  ;;  %v571_v54 = vadd.f32 %v1430_v58, %v570_v51  ;;  %1158 = vmatmul.mubr.msk.f32.gmra.mrb[6].mxu1 %vm638_vm1, %v618_v47  ;;  %v620_v56 = vmul.f32 %v1209_v49, %v604_v52  ;;  %v607_v58 = vld [vmem:[%s1441_s29 + $0x60] sm:$0xff] }
 0x109   : > { %1220 = vtanh.f32 %v576_v50  ;;  %v619_v55 = vmul.f32 %v1211_v53, %v603_v48 }
 0x10a   : > { %1222 = vtanh.f32 %v571_v54 }
 0x10b   : > { %v1213_v59 = vpop.eup %1212  ;;  %1160 = vmatprep.mubr.msk.f32.mxu1 %vm638_vm1, %v619_v55 }
 0x10c   : > { %v1215_v61 = vpop.eup %1214  ;;  %1161 = vmatmul.mubr.msk.f32.gmra.mrb[8].mxu1 %vm638_vm1, %v620_v56  ;;  %v622_v63 = vmul.f32 %v1213_v59, %v606_v60 }
 0x10d   : > { %v621_v62 = vmul.f32 %v1215_v61, %v605_v57 }
 0x10f   : > { %v1217_v0 = vpop.eup %1216  ;;  %1163 = vmatprep.mubr.msk.f32.mxu1 %vm638_vm1, %v621_v62 }
 0x110   : > { %v1219_v2 = vpop.eup %1218  ;;  %1164 = vmatmul.mubr.msk.f32.gmra.mrb[10].mxu1 %vm638_vm1, %v622_v63  ;;  %v624_v4 = vmul.f32 %v1217_v0, %v608_v1 }
 0x111   : > { %v623_v3 = vmul.f32 %v1219_v2, %v607_v58 }
 0x113   : > { %v1221_v6 = vpop.eup %1220  ;;  %1166 = vmatprep.mubr.msk.f32.mxu1 %vm638_vm1, %v623_v3 }
 0x114   : > { %v1223_v8 = vpop.eup %1222  ;;  %1167 = vmatmul.mubr.msk.f32.gmra.mrb[12].mxu1 %vm638_vm1, %v624_v4  ;;  %v626_v10 = vmul.f32 %v1221_v6, %v610_v7 }
 0x115   : > { %v625_v9 = vmul.f32 %v1223_v8, %v609_v5 }
 0x117   : > { %1169 = vmatprep.mubr.msk.f32.mxu1 %vm638_vm1, %v625_v9 }
 0x118   : > { %1170 = vmatmul.mubr.msk.f32.gmra.mrb[14].mxu1 %vm638_vm1, %v626_v10 }
 0x1cf   : > { %v1150_v12 = vpop.f32.mrb[0].mxu1 }
 0x1d0   : > { %v759_v13 = vadd.f32 %v1150_v12, %v1486_v11  ;;  %v753_v14 = vpop.f32.mrb[1].mxu1 }
 0x1d1   : > { %v754_v15 = vadd.f32 %v1486_v11, %v753_v14 }
 0x1d2   : > { %v833_v16 = vsub.f32 0.0, %v759_v13 }
 0x1d3   : > { %v832_v17 = vsub.f32 0.0, %v754_v15  ;;  %v1153_v18 = vpop.f32.mrb[2].mxu1 }
 0x1d4   : > { %v850_v19 = vmul.f32 1.442695, %v833_v16  ;;  %v769_v20 = vadd.f32 %v1153_v18, %v1486_v11  ;;  %v763_v21 = vpop.f32.mrb[3].mxu1 }
 0x1d5   : > { %v848_v22 = vmul.f32 1.442695, %v832_v17  ;;  %v764_v23 = vadd.f32 %v1486_v11, %v763_v21 }
 0x1d6   : > { %1224 = vpow2.f32 %v850_v19  ;;  %v835_v24 = vsub.f32 0.0, %v769_v20 }
 0x1d7   : > { %1226 = vpow2.f32 %v848_v22  ;;  %v834_v25 = vsub.f32 0.0, %v764_v23  ;;  %v1156_v26 = vpop.f32.mrb[4].mxu1 }
 0x1d8   : > { %v854_v27 = vmul.f32 1.442695, %v835_v24  ;;  %v779_v28 = vadd.f32 %v1156_v26, %v1486_v11  ;;  %v773_v29 = vpop.f32.mrb[5].mxu1 }
 0x1d9   : > { %v852_v30 = vmul.f32 1.442695, %v834_v25  ;;  %v774_v31 = vadd.f32 %v1486_v11, %v773_v29 }
 0x1da   : > { %1228 = vpow2.f32 %v854_v27  ;;  %v837_v32 = vsub.f32 0.0, %v779_v28 }
 0x1db   : > { %1230 = vpow2.f32 %v852_v30  ;;  %v836_v33 = vsub.f32 0.0, %v774_v31  ;;  %v1159_v34 = vpop.f32.mrb[6].mxu1 }
 0x1dc   : > { %v858_v35 = vmul.f32 1.442695, %v837_v32  ;;  %v789_v36 = vadd.f32 %v1159_v34, %v1486_v11  ;;  %v783_v37 = vpop.f32.mrb[7].mxu1 }
 0x1dd   : > { %v856_v38 = vmul.f32 1.442695, %v836_v33  ;;  %v784_v39 = vadd.f32 %v1486_v11, %v783_v37 }
 0x1de   : > { %1232 = vpow2.f32 %v858_v35  ;;  %v839_v40 = vsub.f32 0.0, %v789_v36 }
 0x1df   : > { %1234 = vpow2.f32 %v856_v38  ;;  %v838_v41 = vsub.f32 0.0, %v784_v39  ;;  %v1162_v42 = vpop.f32.mrb[8].mxu1 }
 0x1e0   : > { %v1225_v43 = vpop.eup %1224  ;;  %v862_v44 = vmul.f32 1.442695, %v839_v40  ;;  %v799_v45 = vadd.f32 %v1162_v42, %v1486_v11  ;;  %v793_v46 = vpop.f32.mrb[9].mxu1 }
 0x1e1   : > { %v1227_v47 = vpop.eup %1226  ;;  %v881_v48 = vadd.f32 1.0, %v1225_v43  ;;  %v860_v49 = vmul.f32 1.442695, %v838_v41  ;;  %v794_v50 = vadd.f32 %v1486_v11, %v793_v46 }
 0x1e2   : > { %v880_v51 = vadd.f32 1.0, %v1227_v47  ;;  %1236 = vpow2.f32 %v862_v44  ;;  %v841_v52 = vsub.f32 0.0, %v799_v45 }
 0x1e3   : > { %1238 = vrcp.f32 %v881_v48  ;;  %v840_v53 = vsub.f32 0.0, %v794_v50  ;;  %v1165_v54 = vpop.f32.mrb[10].mxu1 }
 0x1e4   : > { %v1229_v55 = vpop.eup %1228  ;;  %1240 = vrcp.f32 %v880_v51  ;;  %v866_v56 = vmul.f32 1.442695, %v841_v52  ;;  %v809_v57 = vadd.f32 %v1165_v54, %v1486_v11  ;;  %v803_v59 = vpop.f32.mrb[11].mxu1 }
 0x1e5   : > { %v1231_v60 = vpop.eup %1230  ;;  %v883_v61 = vadd.f32 1.0, %v1229_v55  ;;  %1242 = vpow2.f32 %v860_v49  ;;  %v864_v62 = vmul.f32 1.442695, %v840_v53  ;;  %v804_v63 = vadd.f32 %v1486_v11, %v803_v59 }
 0x1e6   : > { %v882_v58 = vadd.f32 1.0, %v1231_v60  ;;  %1244 = vpow2.f32 %v866_v56  ;;  %v843_v0 = vsub.f32 0.0, %v809_v57 }
 0x1e7   : > { %1246 = vrcp.f32 %v883_v61  ;;  %v842_v1 = vsub.f32 0.0, %v804_v63  ;;  %v1168_v2 = vpop.f32.mrb[12].mxu1 }
 0x1e8   : > { %v1233_v3 = vpop.eup %1232  ;;  %1248 = vrcp.f32 %v882_v58  ;;  %v870_v4 = vmul.f32 1.442695, %v843_v0  ;;  %v819_v5 = vadd.f32 %v1168_v2, %v1486_v11  ;;  %v813_v6 = vpop.f32.mrb[13].mxu1 }
 0x1e9   : > { %v1235_v7 = vpop.eup %1234  ;;  %v885_v8 = vadd.f32 1.0, %v1233_v3  ;;  %1250 = vpow2.f32 %v864_v62  ;;  %v868_v9 = vmul.f32 1.442695, %v842_v1  ;;  %v814_v10 = vadd.f32 %v1486_v11, %v813_v6 }
 0x1ea   : > { %v884_v12 = vadd.f32 1.0, %v1235_v7  ;;  %1252 = vpow2.f32 %v870_v4  ;;  %v845_v13 = vsub.f32 0.0, %v819_v5 }
 0x1eb   : > { %1254 = vrcp.f32 %v885_v8  ;;  %v844_v14 = vsub.f32 0.0, %v814_v10  ;;  %v1171_v15 = vpop.f32.mrb[14].mxu1 }
 0x1ec   : > { %v1237_v16 = vpop.eup %1236  ;;  %1256 = vrcp.f32 %v884_v12  ;;  %v874_v17 = vmul.f32 1.442695, %v845_v13  ;;  %v829_v18 = vadd.f32 %v1171_v15, %v1486_v11  ;;  %v823_v19 = vpop.f32.mrb[15].mxu1 }
 0x1ed   : > { %v1239_v20 = vpop.eup %1238  ;;  %v887_v21 = vadd.f32 1.0, %v1237_v16  ;;  %1258 = vpow2.f32 %v868_v9  ;;  %v872_v22 = vmul.f32 1.442695, %v844_v14  ;;  %v824_v23 = vadd.f32 %v1486_v11, %v823_v19 }
 0x1ee   : > { %v1241_v24 = vpop.eup %1240  ;;  %930 = vst.msk [vmem:[%s1506_s8 + $0x8] sm:$0xff] %vm928_vm2, %v1239_v20  ;;  %1260 = vpow2.f32 %v874_v17  ;;  %v847_v25 = vsub.f32 0.0, %v829_v18 }
 0x1ef   : > { %v1243_v26 = vpop.eup %1242  ;;  %929 = vst.msk [vmem:[%s1506_s8] sm:$0xff] %vm928_vm2, %v1241_v24  ;;  %1262 = vrcp.f32 %v887_v21  ;;  %v846_v27 = vsub.f32 0.0, %v824_v23 }
 0x1f0   : > { %v1245_v28 = vpop.eup %1244  ;;  %v886_v29 = vadd.f32 1.0, %v1243_v26  ;;  %1264 = vpow2.f32 %v872_v22  ;;  %v878_v30 = vmul.f32 1.442695, %v847_v25 }
 0x1f1   : > { %v1247_v31 = vpop.eup %1246  ;;  %v889_v32 = vadd.f32 1.0, %v1245_v28  ;;  %v876_v11 = vmul.f32 1.442695, %v846_v27 }
 0x1f2   : > { %v1249_v33 = vpop.eup %1248  ;;  %932 = vst.msk [vmem:[%s1506_s8 + $0x18] sm:$0xff] %vm928_vm2, %v1247_v31  ;;  %1266 = vrcp.f32 %v886_v29 }
 0x1f3   : > { %v1251_v34 = vpop.eup %1250  ;;  %931 = vst.msk [vmem:[%s1506_s8 + $0x10] sm:$0xff] %vm928_vm2, %v1249_v33  ;;  %1268 = vrcp.f32 %v889_v32 }
 0x1f4   : > { %v1253_v35 = vpop.eup %1252  ;;  %v888_v36 = vadd.f32 1.0, %v1251_v34  ;;  %1270 = vpow2.f32 %v878_v30 }
 0x1f5   : > { %v1255_v37 = vpop.eup %1254  ;;  %v891_v38 = vadd.f32 1.0, %v1253_v35  ;;  %1272 = vpow2.f32 %v876_v11 }
 0x1f6   : > { %v1257_v39 = vpop.eup %1256  ;;  %934 = vst.msk [vmem:[%s1506_s8 + $0x28] sm:$0xff] %vm928_vm2, %v1255_v37  ;;  %1274 = vrcp.f32 %v888_v36 }
 0x1f7   : > { %v1259_v40 = vpop.eup %1258  ;;  %933 = vst.msk [vmem:[%s1506_s8 + $0x20] sm:$0xff] %vm928_vm2, %v1257_v39  ;;  %1276 = vrcp.f32 %v891_v38 }
 0x1f8   : > { %v1261_v41 = vpop.eup %1260  ;;  %v890_v42 = vadd.f32 1.0, %v1259_v40 }
 0x1f9   : > { %v1263_v43 = vpop.eup %1262  ;;  %v893_v44 = vadd.f32 1.0, %v1261_v41 }
 0x1fa   : > { %v1265_v45 = vpop.eup %1264  ;;  %936 = vst.msk [vmem:[%s1506_s8 + $0x38] sm:$0xff] %vm928_vm2, %v1263_v43  ;;  %1278 = vrcp.f32 %v890_v42 }
 0x1fb   : > { %1280 = vrcp.f32 %v893_v44  ;;  %v892_v46 = vadd.f32 1.0, %v1265_v45 }
 0x1fc   : > { %v1267_v47 = vpop.eup %1266 }
 0x1fd   : > { %v1269_v48 = vpop.eup %1268  ;;  %935 = vst.msk [vmem:[%s1506_s8 + $0x30] sm:$0xff] %vm928_vm2, %v1267_v47  ;;  %1282 = vrcp.f32 %v892_v46 }
 0x1fe   : > { %v1271_v49 = vpop.eup %1270  ;;  %938 = vst.msk [vmem:[%s1506_s8 + $0x48] sm:$0xff] %vm928_vm2, %v1269_v48 }
 0x1ff   : > { %v1273_v50 = vpop.eup %1272  ;;  %v895_v51 = vadd.f32 1.0, %v1271_v49 }
 0x200   : > { %v1275_v52 = vpop.eup %1274  ;;  %v894_v53 = vadd.f32 1.0, %v1273_v50 }
 0x201   : > { %v1277_v54 = vpop.eup %1276  ;;  %937 = vst.msk [vmem:[%s1506_s8 + $0x40] sm:$0xff] %vm928_vm2, %v1275_v52  ;;  %1284 = vrcp.f32 %v895_v51 }
 0x202   : > { %940 = vst.msk [vmem:[%s1506_s8 + $0x58] sm:$0xff] %vm928_vm2, %v1277_v54  ;;  %1286 = vrcp.f32 %v894_v53 }
 0x204   : > { %v1279_v55 = vpop.eup %1278 }
 0x205   : > { %v1281_v56 = vpop.eup %1280  ;;  %939 = vst.msk [vmem:[%s1506_s8 + $0x50] sm:$0xff] %vm928_vm2, %v1279_v55 }
 0x206   : > { %942 = vst.msk [vmem:[%s1506_s8 + $0x68] sm:$0xff] %vm928_vm2, %v1281_v56 }
 0x207   : > { %v1283_v57 = vpop.eup %1282 }
 0x208   : > { %941 = vst.msk [vmem:[%s1506_s8 + $0x60] sm:$0xff] %vm928_vm2, %v1283_v57 }
 0x20b   : > { %v1285_v59 = vpop.eup %1284 }
 0x20c   : > { %v1287_v60 = vpop.eup %1286  ;;  %944 = vst.msk [vmem:[%s1506_s8 + $0x78] sm:$0xff] %vm928_vm2, %v1285_v59 }
 0x20d   : > { %943 = vst.msk [vmem:[%s1506_s8 + $0x70] sm:$0xff] %vm928_vm2, %v1287_v60 }
 0x20e PF: > { %s19_s26 = sadd.s32 1, %s1294_s26  }
 0x20f   : > { %p16_p4 = scmp.ge.s32.totalorder %s19_s26, 6  }
 0x211   :  { %18 = sbr.rel (!%p16_p4) target bundleno = 3 (0x3), region = 84 }

</bundles_post_ra>
